<compile_context>
chip_gen: v7x
topology: tpu7x:2x2x1
jax: 0.10.0
libtpu: 0.0.40
codegen_flags: <defaults>
</compile_context>

<pallas_src>
import math

import jax
import jax.numpy as jnp
from jax.experimental import pallas as pl
from jax.experimental.pallas import tpu as pltpu

_LANE = 128      # lane width (last dim of a vreg)
_SUBLANE = 8     # sublane count (second-minor dim of a vreg)
_TINY_BYTES = 256 * 1024          # below this, a fused XLA add beats a kernel launch
_VMEM_LIMIT = 32 * 1024 * 1024    # safe on v5e/v6e (128 MiB phys) and v7x (64 MiB phys)


def _build_pe_table(d_model: int, max_len: int = 10000) -> jnp.ndarray:
    """Deterministic sin/cos positional-encoding table (matches torch __init__).

    Note: odd d_model truncates the cos half instead of erroring (the torch
    original would raise there) -- documented semantic difference.
    """
    position = jnp.arange(0, max_len, dtype=jnp.float32)[:, None]            # (max_len, 1)
    div_term = jnp.exp(
        jnp.arange(0, d_model, 2, dtype=jnp.float32) * (-math.log(10000.0) / d_model)
    )                                                                         # (ceil(d/2),)
    args = position * div_term                                                # (max_len, ceil(d/2))
    pe = jnp.zeros((max_len, d_model), dtype=jnp.float32)
    pe = pe.at[:, 0::2].set(jnp.sin(args))
    pe = pe.at[:, 1::2].set(jnp.cos(args)[:, : d_model // 2])
    return pe


def _pe_add_kernel(x_ref, pe_ref, o_ref):
    # x_ref: (TB, TC) tile of flattened x; pe_ref: (1, TC) f32 tile shared over batch.
    # Add in f32, cast fused into the store (no standalone pe-convert pass in HBM).
    o_ref[...] = (x_ref[...].astype(jnp.float32) + pe_ref[...]).astype(o_ref.dtype)


def _per_buffer_budget_bytes() -> int:
    """Generation-gated per-block byte budget."""
    try:
        kind = jax.devices()[0].device_kind.lower()
    except Exception:  # pragma: no cover - defensive, budget fallback is safe
        kind = ""
    if ("v5 lite" in kind) or ("v5e" in kind) or ("v5lite" in kind):
        return 2 * 1024 * 1024   # v5e: ~0.8 TB/s HBM, 16 MiB scoped default -> small tiles fine
    return 4 * 1024 * 1024       # v6e/v7x: larger tiles amortize ~0.35 us per-step overhead


def _choose_tiles(B: int, F: int, itemsize: int, budget: int):
    """Pick (row_tile, col_tile) for the flattened (B, F) add. F is a multiple of 128."""
    tc_max = max(_LANE, (budget // (_SUBLANE * itemsize)) // _LANE * _LANE)
    tc = min(F, tc_max)

    if B <= _SUBLANE:
        tb = B  # full batch dim -> always a legal block shape
    else:
        rows = max(_SUBLANE, budget // max(1, tc * itemsize))
        tb = min(B, (rows // _SUBLANE) * _SUBLANE)

    # v7x megacore: a non-trivial problem should have >= 2 grid steps so the
    # "parallel" axes can actually be sharded across the two TensorCores.
    if (pl.cdiv(F, tc) * pl.cdiv(B, tb) < 2
            and B * F * itemsize > 2 * 1024 * 1024
            and F >= 2 * _LANE):
        tc = max(_LANE, (F // 2) // _LANE * _LANE)

    return tb, tc


def temporal_positional_encoding(x: jnp.ndarray, pe_table: jnp.ndarray,
                                 *, force_pallas: bool = False) -> jnp.ndarray:
    """x: (B, L, D). Returns x + pe_table[:L] broadcast over batch, in x.dtype."""
    B, L, D = x.shape
    max_len, d_model = pe_table.shape
    if L > max_len:
        raise ValueError(f"sequence length {L} exceeds max_len {max_len}")
    if D != d_model:
        raise ValueError(f"d_model mismatch: x has {D}, pe table has {d_model}")

    F = L * D
    itemsize = jnp.dtype(x.dtype).itemsize

    # pe slice stays f32 (no per-forward dtype-convert pass); same column extent
    # as the flattened x so both arrays tile/clamp identically.
    pe2 = pe_table[:L].reshape(1, F)

    # Tiny-problem fast path: kernel launch + DMA setup dominates sub-vreg-scale work.
    if not force_pallas and B * F * itemsize < _TINY_BYTES:
        return (x.astype(jnp.float32) + pe2.reshape(1, L, D)).astype(x.dtype)

    x2 = x.reshape(B, F)  # lane-dense flattened view (free reshape)

    # Bounded lane-dense fallback for F % 128 != 0: pad columns, slice after.
    pad = (-F) % _LANE
    Fc = F + pad
    if pad:
        # TODO(synk): padding costs one extra x round-trip; a (tb, TL, D) 3-D
        # blocking would avoid it at the cost of masked stores when D < 128.
        x2 = jnp.pad(x2, ((0, 0), (0, pad)))
        pe2 = jnp.pad(pe2, ((0, 0), (0, pad)))

    budget = _per_buffer_budget_bytes()
    tb, tc = _choose_tiles(B, Fc, itemsize, budget)

    # Column tiles outermost, batch tiles innermost: the pe block index only
    # depends on the column tile, so it is DMA'd once per column tile and kept
    # resident across all batch tiles.
    grid = (pl.cdiv(Fc, tc), pl.cdiv(B, tb))

    out2 = pl.pallas_call(
        _pe_add_kernel,
        out_shape=jax.ShapeDtypeStruct((B, Fc), x.dtype),
        grid_spec=pltpu.PrefetchScalarGridSpec(
            num_scalar_prefetch=0,
            grid=grid,
            in_specs=[
                pl.BlockSpec((tb, tc), lambda c, b: (b, c)),   # x tile
                pl.BlockSpec((1, tc), lambda c, b: (0, c)),    # pe tile (f32, shared over batch)
            ],
            out_specs=pl.BlockSpec((tb, tc), lambda c, b: (b, c)),
        ),
        input_output_aliases={0: 0},   # elementwise add: write in place over x2
        compiler_params=pltpu.CompilerParams(
            dimension_semantics=("parallel", "parallel"),
            vmem_limit_bytes=_VMEM_LIMIT,
        ),
    )(x2, pe2)

    if pad:
        out2 = out2[:, :F]
    return out2.reshape(B, L, D)


if __name__ == "__main__":
    MAX_LEN = 10000  # same default as the PyTorch module
    key = jax.random.PRNGKey(0)
    k1, k2 = jax.random.split(key)

    # Small shapes consistent with the module: batch=2, seq=8, d_model=32.
    B, L, D = 2, 8, 32
    x = jax.random.normal(k1, (B, L, D), dtype=jnp.float32)
    pe_table = _build_pe_table(D, MAX_LEN)

    out = temporal_positional_encoding(x, pe_table, force_pallas=True)
    out = jax.block_until_ready(out)
    ref = x + pe_table[:L][None, :, :]
    assert out.shape == (B, L, D)
    assert out.dtype == jnp.float32
    assert jnp.allclose(out, ref, atol=1e-6, rtol=1e-6)

    # Non-128-aligned feature count (L*D = 288): exercises the padded fallback.
    B2, L2, D2 = 2, 8, 36
    x_b = jax.random.normal(k2, (B2, L2, D2), dtype=jnp.float32)
    pe_table_b = _build_pe_table(D2, MAX_LEN)
    out_b = temporal_positional_encoding(x_b, pe_table_b, force_pallas=True)
    out_b = jax.block_until_ready(out_b)
    ref_b = x_b + pe_table_b[:L2][None, :, :]
    assert jnp.allclose(out_b, ref_b, atol=1e-6, rtol=1e-6)

    # Tiny-problem fast path agrees with the kernel.
    out_fast = temporal_positional_encoding(x, pe_table)
    assert jnp.allclose(out_fast, ref, atol=1e-6, rtol=1e-6)

    print("KERNEL_OK")
</pallas_src>

<mosaic_0001>
module attributes {stable_mosaic.version = 11 : i64} {
  func.func @_pe_add_kernel(%arg0: i32, %arg1: i32, %arg2: memref<2x256xf32, #tpu.memory_space<vmem>>, %arg3: memref<1x256xf32, #tpu.memory_space<vmem>>, %arg4: memref<2x256xf32, #tpu.memory_space<vmem>>) attributes {dimension_semantics = [#tpu.dimension_semantics<parallel>, #tpu.dimension_semantics<parallel>], iteration_bounds = array<i64: 1, 1>, scalar_prefetch = 0 : i64, scratch_operands = 0 : i64, tpu.core_type = #tpu.core_type<tc>, window_params = [{transform_indices = @transform_0, window_bounds = array<i64: 2, 256>}, {transform_indices = @transform_1, window_bounds = array<i64: 1, 256>}, {transform_indices = @transform_2, window_bounds = array<i64: 2, 256>}]} {
    %c0 = arith.constant 0 : index
    %c0_0 = arith.constant 0 : index
    %0 = vector.load %arg2[%c0, %c0_0] : memref<2x256xf32, #tpu.memory_space<vmem>>, vector<2x256xf32>
    %c0_1 = arith.constant 0 : index
    %c0_2 = arith.constant 0 : index
    %1 = vector.load %arg3[%c0_1, %c0_2] : memref<1x256xf32, #tpu.memory_space<vmem>>, vector<1x256xf32>
    %2 = vector.broadcast %1 : vector<1x256xf32> to vector<2x256xf32>
    %3 = arith.addf %0, %2 : vector<2x256xf32>
    %c0_3 = arith.constant 0 : index
    %c0_4 = arith.constant 0 : index
    %4 = vector.load %arg4[%c0_3, %c0_4] : memref<2x256xf32, #tpu.memory_space<vmem>>, vector<2x256xf32>
    tpu.vector_store %arg4[%c0_3, %c0_4], %3 {strides = array<i32>} : memref<2x256xf32, #tpu.memory_space<vmem>>, vector<2x256xf32>,
    return
  }
  func.func @transform_0(%arg0: i32, %arg1: i32) -> (i32, i32) {
    %c0_i32 = arith.constant 0 : i32
    return %arg1, %arg0 : i32, i32
  }
  func.func @transform_1(%arg0: i32, %arg1: i32) -> (i32, i32) {
    %c0_i32 = arith.constant 0 : i32
    %c0_i32_0 = arith.constant 0 : i32
    return %c0_i32, %arg0 : i32, i32
  }
  func.func @transform_2(%arg0: i32, %arg1: i32) -> (i32, i32) {
    %c0_i32 = arith.constant 0 : i32
    return %arg1, %arg0 : i32, i32
  }
}

</mosaic_0001>

<bundles_post_ra>
// kernel: tpu_custom_call.1
= control target key start
LH: loop header
LB: loop body
LE: loop exit
PB: predicated region body
PF: predicated region fallthrough
CT: control target
= control target key end

     0   :  { %7 = vsyncpa [#allocation3], 0  ;;  %s157_s0 = inlined_call_operand.hbm [shape: f32[2,256], index: 0, kind: input, shape index: {}, may-alias: {0,2}]   ;;  %s158_s1 = inlined_call_operand.vmem [shape: f32[1,256], index: 1, kind: input, shape index: {}]   ;;  %s159_s2 = inlined_call_operand.hbm [shape: f32[2,256], index: 2, kind: output, shape index: {}, may-alias: {0,2}]  }
   0x1   :  { %8 = vsyncpa [#allocation4], 0  ;;  %s112_s9 = smov [#allocation2]   ;;  %s64_s13 = scalar_lea.hbm %s157_s0, 64 }
   0x2   :  { %s15_s10 = sshll.u32 %s112_s9, 4  ;;  %p65_p0 = scmp.ne.s32.totalorder %s157_s0, %s64_s13  ;;  %s16_s10 = int_to_ptr.vmem [resolvable:$true] %s15_s10 }
   0x3   :  { %p68_p1 = scmp.lt.u32.totalorder %s64_s13, %s157_s0 }
   0x5   :  { %p70_p2 = pnand %p68_p1, %p65_p0 }
   0x7   :  { %73 = shalt.err (!%p70_p2)
}
   0x8   :  { %s74_s18 = scalar_lea.vmem %s16_s10, 64  ;;  %p79_p4 = scmp.lt.s32.totalorder %s16_s10, %s16_s10 }
   0x9   :  { %p75_p3 = scmp.ne.s32.totalorder %s16_s10, %s74_s18  ;;  %p80_p5 = scmp.lt.s32.totalorder %s74_s18, %s74_s18 }
   0xb   :  { %p81_p6 = por %p80_p5, %p79_p4 }
   0xd   :  { %p82_p7 = pnand %p81_p6, %p75_p3 }
   0xf   :  { %85 = shalt.err (!%p82_p7)
}
  0x10   :  { %18 = dma.hbm_to_vmem [thread:$0]  %s157_s0, 64, %s16_s10, [#allocation3]  }
  0x11   :  { %108 = dma.done.wait [#allocation3], 64  }
  0x12   :  { %109 = vsyncadd [#allocation3], 4294967232  ;;  %v27_v0 = vlaneseq  ;;  %v113_v1 = vmov 1983009808   ;;  %v25_v7 = vld [vmem:[%s158_s1] sm:$0x3] }
  0x13   :  { %v37_v2 = vunpack.c.l.s4 %v113_v1  ;;  %v24_v12 = vld [vmem:[#allocation2] sm:$0xf]  ;;  %s114_s23 = smov [#allocation5]  }
  0x14   :  { %v28_v3 = vshrl.u32 %v27_v0, 7  ;;  %s52_s0 = sshll.u32 %s114_s23, 4  ;;  %s53_s0 = int_to_ptr.vmem [resolvable:$true] %s52_s0 }
  0x15   :  { %v38_v6 = vunpack.c.0.s8 %v37_v2  ;;  %s86_s24 = scalar_lea.vmem %s53_s0, 64  ;;  %p91_p9 = scmp.lt.s32.totalorder %s53_s0, %s53_s0 }
  0x16   :  { %v29_v4 = vsub.s32 0, %v28_v3  ;;  %v33_v5 = vsub.s32 1, %v28_v3  ;;  %p87_p8 = scmp.ne.s32.totalorder %s53_s0, %s86_s24  ;;  %p92_p10 = scmp.lt.s32.totalorder %s86_s24, %s86_s24 }
  0x17   :  { %v41_v10 = vsub.s32 %v38_v6, %v28_v3 }
  0x18   :  { %v30_v8 = vrot.slane %v25_v7, %v29_v4  ;;  %v34_v9 = vrot.slane %v25_v7, %v33_v5  ;;  %p93_p11 = por %p92_p10, %p91_p9 }
  0x1a   :  { %v35_v11 = vcombine.low %v30_v8, %v34_v9  ;;  %p94_p12 = pnand %p93_p11, %p87_p8 }
  0x1c   :  { %v42_v13 = vrot.slane %v35_v11, %v41_v10 }
  0x1e   :  { %v44_v14 = vadd.f32 %v42_v13, %v24_v12 }
  0x20   :  { %45 = vst [vmem:[#allocation5] sm:$0xf] %v44_v14 }
  0x21   :  { %97 = shalt.err (!%p94_p12)
}
  0x22   :  { %s98_s26 = scalar_lea.hbm %s159_s2, 64 }
  0x23   :  { %p99_p13 = scmp.ne.s32.totalorder %s159_s2, %s98_s26  ;;  %p102_p0 = scmp.lt.u32.totalorder %s98_s26, %s159_s2 }
  0x25   :  { %p104_p1 = pnand %p102_p0, %p99_p13 }
  0x27   :  { %107 = shalt.err (!%p104_p1)
}
  0x28   :  { %55 = dma.vmem_to_hbm [thread:$0]  %s53_s0, 64, %s159_s2, [#allocation4]  }
  0x29   :  { %110 = dma.done.wait [#allocation4], 64  }
  0x2a   :  { %111 = vsyncadd [#allocation4], 4294967232 }
  0x2b   :  { %59 = vsyncpa [#allocation3], 1 }
  0x2c   :  { %60 = vsyncpa [#allocation4], 1 }

</bundles_post_ra>
